<compile_context>
chip_gen: v7x
topology: tpu7x:2x2x1
jax: 0.10.0
libtpu: 0.0.40
codegen_flags: <defaults>
</compile_context>

<pallas_src>
import functools

import jax
import jax.numpy as jnp
from jax.experimental import pallas as pl
from jax.experimental.pallas import tpu as pltpu

LANE = 128
T_TILE_DEFAULT = 256  # fills the 2x256^2 MXU M-dim on v6e/v7x; >=128 for v5e.


def _round_up(x, m):
    return ((x + m - 1) // m) * m


def _mlp_kernel(x_ref, w1t_ref, b1_ref, w2t_ref, b2_ref, w3t_ref, b3_ref, o_ref):
    # Layer 1: relu(x @ W1.T + b1) -- bf16 MXU operands, f32 accumulate/epilogue.
    h1 = jnp.dot(x_ref[...].astype(jnp.bfloat16), w1t_ref[...],
                 preferred_element_type=jnp.float32)
    h1 = jnp.maximum(h1 + b1_ref[...], 0.0)
    # Layer 2: relu(h1 @ W2.T + b2)
    h2 = jnp.dot(h1.astype(jnp.bfloat16), w2t_ref[...],
                 preferred_element_type=jnp.float32)
    h2 = jnp.maximum(h2 + b2_ref[...], 0.0)
    # Layer 3 (nn.Linear, lane-padded to 128 outputs): h2 @ W3.T + b3
    y = jnp.dot(h2.astype(jnp.bfloat16), w3t_ref[...],
                preferred_element_type=jnp.float32) + b3_ref[...]
    o_ref[...] = y.astype(o_ref.dtype)


def prepare_params(w1, b1, w2, b2, w3, b3):
    """One-time parameter prep (do this OUTSIDE the per-step forward call):
    transpose weights to (in, out) for row-major MXU matmuls, cast weights to
    bf16, and zero-pad the 10-wide output layer to a lane-dense 128 columns."""
    n_hidden = w1.shape[0]
    n_out = w3.shape[0]
    n_out_pad = _round_up(n_out, LANE)

    w1t = jnp.asarray(w1, jnp.float32).T.astype(jnp.bfloat16)          # (in, hid)
    w2t = jnp.asarray(w2, jnp.float32).T.astype(jnp.bfloat16)          # (hid, hid)
    w3t = jnp.zeros((n_hidden, n_out_pad), jnp.bfloat16)
    w3t = w3t.at[:, :n_out].set(jnp.asarray(w3, jnp.float32).T.astype(jnp.bfloat16))
    b1r = jnp.asarray(b1, jnp.float32).reshape(1, n_hidden)
    b2r = jnp.asarray(b2, jnp.float32).reshape(1, n_hidden)
    b3r = jnp.zeros((1, n_out_pad), jnp.float32)
    b3r = b3r.at[0, :n_out].set(jnp.asarray(b3, jnp.float32).reshape(-1))
    return (w1t, b1r, w2t, b2r, w3t, b3r, n_out)


@functools.partial(jax.jit, static_argnames=("n_out", "t_tile"))
def _forward_impl(x, w1t, b1, w2t, b2, w3t, b3, *, n_out, t_tile):
    T, in_dim = x.shape
    n_hidden = w1t.shape[1]
    n_out_pad = w3t.shape[1]

    # Tile the time axis; pad the tail block with zero rows (sliced off below).
    t_tile = min(t_tile, _round_up(max(T, 8), 8))
    t_pad = _round_up(T, t_tile)
    if t_pad != T:
        x = jnp.pad(x, ((0, t_pad - T), (0, 0)))

    out = pl.pallas_call(
        _mlp_kernel,
        out_shape=jax.ShapeDtypeStruct((t_pad, n_out_pad), jnp.float32),
        grid=(t_pad // t_tile,),
        in_specs=[
            pl.BlockSpec((t_tile, in_dim), lambda i: (i, 0)),     # x: tiled over T
            pl.BlockSpec((in_dim, n_hidden), lambda i: (0, 0)),   # weights/biases:
            pl.BlockSpec((1, n_hidden), lambda i: (0, 0)),        # constant index_map
            pl.BlockSpec((n_hidden, n_hidden), lambda i: (0, 0)), # -> VMEM-resident
            pl.BlockSpec((1, n_hidden), lambda i: (0, 0)),
            pl.BlockSpec((n_hidden, n_out_pad), lambda i: (0, 0)),
            pl.BlockSpec((1, n_out_pad), lambda i: (0, 0)),
        ],
        out_specs=pl.BlockSpec((t_tile, n_out_pad), lambda i: (i, 0)),
        compiler_params=pltpu.CompilerParams(
            dimension_semantics=("parallel",),   # shard T across v7x TensorCores
            vmem_limit_bytes=8 << 20,            # right-sized (< 4 MiB working set)
        ),
    )(x, w1t, b1, w2t, b2, w3t, b3)
    return out[:T, :n_out]


def sparse_delay_mlp_forward(x, params, *, t_tile=T_TILE_DEFAULT):
    """x: (T, in_dim) f32.  params: output of prepare_params().
    Returns logits (T, 10)."""
    w1t, b1, w2t, b2, w3t, b3, n_out = params
    return _forward_impl(x, w1t, b1, w2t, b2, w3t, b3, n_out=n_out, t_tile=t_tile)


def _xavier_uniform(key, shape):
    fan_out, fan_in = shape[0], shape[1]
    bound = (6.0 / (fan_in + fan_out)) ** 0.5
    return jax.random.uniform(key, shape, jnp.float32, -bound, bound)


if __name__ == "__main__":
    # Shapes implied by the module: MNIST input (cifar_10=False) -> in_dim=28*28,
    # small batch/time T, small n_hidden, 10 output classes.
    in_dim = 28 * 28
    n_hidden = 32
    n_out = 10

    key = jax.random.PRNGKey(0)
    kx, k1, kb1, k2, kb2, k3, kb3, kx2 = jax.random.split(key, 8)

    # SparseDelayedLinear params: weight (out, in) xavier-uniform, bias (1, out).
    w1 = _xavier_uniform(k1, (n_hidden, in_dim))
    b1 = _xavier_uniform(kb1, (1, n_hidden))
    w2 = _xavier_uniform(k2, (n_hidden, n_hidden))
    b2 = _xavier_uniform(kb2, (1, n_hidden))
    # nn.Linear(n_hidden, 10) params.
    w3 = _xavier_uniform(k3, (n_out, n_hidden))
    b3 = jax.random.uniform(kb3, (n_out,), jnp.float32,
                            -1.0 / (n_hidden ** 0.5), 1.0 / (n_hidden ** 0.5))

    params = prepare_params(w1, b1, w2, b2, w3, b3)

    def reference(x):
        # Pure-JAX reference with the same precision policy as the kernel
        # (bf16 MXU operands, f32 accumulation, f32 bias/ReLU).
        h1 = jnp.maximum(
            jnp.dot(x.astype(jnp.bfloat16), w1.T.astype(jnp.bfloat16),
                    preferred_element_type=jnp.float32) + b1, 0.0)
        h2 = jnp.maximum(
            jnp.dot(h1.astype(jnp.bfloat16), w2.T.astype(jnp.bfloat16),
                    preferred_element_type=jnp.float32) + b2, 0.0)
        return (jnp.dot(h2.astype(jnp.bfloat16), w3.T.astype(jnp.bfloat16),
                        preferred_element_type=jnp.float32)
                + b3.reshape(1, n_out))

    # Case 1: tiny T (single small tile).
    x_small = jax.random.normal(kx, (8, in_dim), jnp.float32)
    out_small = jax.block_until_ready(sparse_delay_mlp_forward(x_small, params))
    ref_small = reference(x_small)
    assert out_small.shape == (8, n_out)
    assert jnp.allclose(out_small, ref_small, atol=1e-2, rtol=1e-2)

    # Case 2: T not divisible by the 256-row tile (exercises grid + tail padding).
    x_big = jax.random.normal(kx2, (520, in_dim), jnp.float32)
    out_big = jax.block_until_ready(sparse_delay_mlp_forward(x_big, params))
    ref_big = reference(x_big)
    assert out_big.shape == (520, n_out)
    assert jnp.allclose(out_big, ref_big, atol=1e-2, rtol=1e-2)

    print("KERNEL_OK")
</pallas_src>

<mosaic_0001>
module attributes {stable_mosaic.version = 11 : i64} {
  func.func @_mlp_kernel(%arg0: i32, %arg1: memref<8x784xf32, #tpu.memory_space<vmem>>, %arg2: memref<784x32xbf16, #tpu.memory_space<vmem>>, %arg3: memref<1x32xf32, #tpu.memory_space<vmem>>, %arg4: memref<32x32xbf16, #tpu.memory_space<vmem>>, %arg5: memref<1x32xf32, #tpu.memory_space<vmem>>, %arg6: memref<32x128xbf16, #tpu.memory_space<vmem>>, %arg7: memref<1x128xf32, #tpu.memory_space<vmem>>, %arg8: memref<8x128xf32, #tpu.memory_space<vmem>>) attributes {dimension_semantics = [#tpu.dimension_semantics<parallel>], iteration_bounds = array<i64: 1>, scalar_prefetch = 0 : i64, scratch_operands = 0 : i64, tpu.core_type = #tpu.core_type<tc>, window_params = [{transform_indices = @transform_0, window_bounds = array<i64: 8, 784>}, {pipeline_mode = #tpu.pipeline_mode<synchronous>, transform_indices = @transform_1, window_bounds = array<i64: 784, 32>}, {pipeline_mode = #tpu.pipeline_mode<synchronous>, transform_indices = @transform_2, window_bounds = array<i64: 1, 32>}, {pipeline_mode = #tpu.pipeline_mode<synchronous>, transform_indices = @transform_3, window_bounds = array<i64: 32, 32>}, {pipeline_mode = #tpu.pipeline_mode<synchronous>, transform_indices = @transform_4, window_bounds = array<i64: 1, 32>}, {pipeline_mode = #tpu.pipeline_mode<synchronous>, transform_indices = @transform_5, window_bounds = array<i64: 32, 128>}, {pipeline_mode = #tpu.pipeline_mode<synchronous>, transform_indices = @transform_6, window_bounds = array<i64: 1, 128>}, {transform_indices = @transform_7, window_bounds = array<i64: 8, 128>}]} {
    %c0 = arith.constant 0 : index
    %c0_0 = arith.constant 0 : index
    %0 = vector.load %arg1[%c0, %c0_0] : memref<8x784xf32, #tpu.memory_space<vmem>>, vector<8x784xf32>
    %1 = arith.truncf %0 : vector<8x784xf32> to vector<8x784xbf16>
    %c0_1 = arith.constant 0 : index
    %c0_2 = arith.constant 0 : index
    %2 = vector.load %arg2[%c0_1, %c0_2] : memref<784x32xbf16, #tpu.memory_space<vmem>>, vector<784x32xbf16>
    %cst = arith.constant dense<0.000000e+00> : vector<8x32xf32>
    %3 = tpu.matmul %1, %2, %cst {dimension_numbers = #tpu.dot_dimension_numbers<[1], [0], [0], [1], [0, 0, 1, 1], [], []>} : vector<8x784xbf16>, vector<784x32xbf16>, vector<8x32xf32> -> vector<8x32xf32>
    %c0_3 = arith.constant 0 : index
    %c0_4 = arith.constant 0 : index
    %4 = vector.load %arg3[%c0_3, %c0_4] : memref<1x32xf32, #tpu.memory_space<vmem>>, vector<1x32xf32>
    %5 = vector.broadcast %4 : vector<1x32xf32> to vector<8x32xf32>
    %6 = arith.addf %3, %5 : vector<8x32xf32>
    %cst_5 = arith.constant 0.000000e+00 : f32
    %7 = vector.broadcast %cst_5 : f32 to vector<8x32xf32>
    %8 = arith.maximumf %6, %7 : vector<8x32xf32>
    %9 = arith.truncf %8 : vector<8x32xf32> to vector<8x32xbf16>
    %c0_6 = arith.constant 0 : index
    %c0_7 = arith.constant 0 : index
    %10 = vector.load %arg4[%c0_6, %c0_7] : memref<32x32xbf16, #tpu.memory_space<vmem>>, vector<32x32xbf16>
    %cst_8 = arith.constant dense<0.000000e+00> : vector<8x32xf32>
    %11 = tpu.matmul %9, %10, %cst_8 {dimension_numbers = #tpu.dot_dimension_numbers<[1], [0], [0], [1], [0, 0, 1, 1], [], []>} : vector<8x32xbf16>, vector<32x32xbf16>, vector<8x32xf32> -> vector<8x32xf32>
    %c0_9 = arith.constant 0 : index
    %c0_10 = arith.constant 0 : index
    %12 = vector.load %arg5[%c0_9, %c0_10] : memref<1x32xf32, #tpu.memory_space<vmem>>, vector<1x32xf32>
    %13 = vector.broadcast %12 : vector<1x32xf32> to vector<8x32xf32>
    %14 = arith.addf %11, %13 : vector<8x32xf32>
    %cst_11 = arith.constant 0.000000e+00 : f32
    %15 = vector.broadcast %cst_11 : f32 to vector<8x32xf32>
    %16 = arith.maximumf %14, %15 : vector<8x32xf32>
    %17 = arith.truncf %16 : vector<8x32xf32> to vector<8x32xbf16>
    %c0_12 = arith.constant 0 : index
    %c0_13 = arith.constant 0 : index
    %18 = vector.load %arg6[%c0_12, %c0_13] : memref<32x128xbf16, #tpu.memory_space<vmem>>, vector<32x128xbf16>
    %cst_14 = arith.constant dense<0.000000e+00> : vector<8x128xf32>
    %19 = tpu.matmul %17, %18, %cst_14 {dimension_numbers = #tpu.dot_dimension_numbers<[1], [0], [0], [1], [0, 0, 1, 1], [], []>} : vector<8x32xbf16>, vector<32x128xbf16>, vector<8x128xf32> -> vector<8x128xf32>
    %c0_15 = arith.constant 0 : index
    %c0_16 = arith.constant 0 : index
    %20 = vector.load %arg7[%c0_15, %c0_16] : memref<1x128xf32, #tpu.memory_space<vmem>>, vector<1x128xf32>
    %21 = vector.broadcast %20 : vector<1x128xf32> to vector<8x128xf32>
    %22 = arith.addf %19, %21 : vector<8x128xf32>
    %c0_17 = arith.constant 0 : index
    %c0_18 = arith.constant 0 : index
    %23 = vector.load %arg8[%c0_17, %c0_18] : memref<8x128xf32, #tpu.memory_space<vmem>>, vector<8x128xf32>
    tpu.vector_store %arg8[%c0_17, %c0_18], %22 {strides = array<i32>} : memref<8x128xf32, #tpu.memory_space<vmem>>, vector<8x128xf32>,
    return
  }
  func.func @transform_0(%arg0: i32) -> (i32, i32) {
    %c0_i32 = arith.constant 0 : i32
    %c0_i32_0 = arith.constant 0 : i32
    return %arg0, %c0_i32 : i32, i32
  }
  func.func @transform_1(%arg0: i32) -> (i32, i32) {
    %c0_i32 = arith.constant 0 : i32
    %c0_i32_0 = arith.constant 0 : i32
    %c0_i32_1 = arith.constant 0 : i32
    return %c0_i32, %c0_i32_0 : i32, i32
  }
  func.func @transform_2(%arg0: i32) -> (i32, i32) {
    %c0_i32 = arith.constant 0 : i32
    %c0_i32_0 = arith.constant 0 : i32
    %c0_i32_1 = arith.constant 0 : i32
    return %c0_i32, %c0_i32_0 : i32, i32
  }
  func.func @transform_3(%arg0: i32) -> (i32, i32) {
    %c0_i32 = arith.constant 0 : i32
    %c0_i32_0 = arith.constant 0 : i32
    %c0_i32_1 = arith.constant 0 : i32
    return %c0_i32, %c0_i32_0 : i32, i32
  }
  func.func @transform_4(%arg0: i32) -> (i32, i32) {
    %c0_i32 = arith.constant 0 : i32
    %c0_i32_0 = arith.constant 0 : i32
    %c0_i32_1 = arith.constant 0 : i32
    return %c0_i32, %c0_i32_0 : i32, i32
  }
  func.func @transform_5(%arg0: i32) -> (i32, i32) {
    %c0_i32 = arith.constant 0 : i32
    %c0_i32_0 = arith.constant 0 : i32
    %c0_i32_1 = arith.constant 0 : i32
    return %c0_i32, %c0_i32_0 : i32, i32
  }
  func.func @transform_6(%arg0: i32) -> (i32, i32) {
    %c0_i32 = arith.constant 0 : i32
    %c0_i32_0 = arith.constant 0 : i32
    %c0_i32_1 = arith.constant 0 : i32
    return %c0_i32, %c0_i32_0 : i32, i32
  }
  func.func @transform_7(%arg0: i32) -> (i32, i32) {
    %c0_i32 = arith.constant 0 : i32
    %c0_i32_0 = arith.constant 0 : i32
    return %arg0, %c0_i32 : i32, i32
  }
}

</mosaic_0001>

<bundles_post_ra>
// kernel: _forward_impl.1
= control target key start
LH: loop header
LB: loop body
LE: loop exit
PB: predicated region body
PF: predicated region fallthrough
CT: control target
= control target key end

     0   :  { %v992_v44 = vmov 0.0   ;;  %vm993_vm0 = vmmov 0   ;;  %vm441_vm1 = vcmask 130048   ;;  %s1249_s0 = inlined_call_operand.vmem [shape: f32[8,784], index: 0, kind: input, shape index: {}]   ;;  %s1250_s1 = inlined_call_operand.vmem [shape: bf16[784,32], index: 1, kind: input, shape index: {}]   ;;  %s1251_s2 = inlined_call_operand.vmem [shape: f32[1,32], index: 2, kind: input, shape index: {}]   ;;  %s1252_s3 = inlined_call_operand.vmem [shape: bf16[32,32], index: 3, kind: input, shape index: {}]   ;;  %s1253_s4 = inlined_call_operand.vmem [shape: f32[1,32], index: 4, kind: input, shape index: {}]   ;;  %s1254_s5 = inlined_call_operand.vmem [shape: bf16[32,128], index: 5, kind: input, shape index: {}]   ;;  %s1255_s6 = inlined_call_operand.vmem [shape: f32[1,128], index: 6, kind: input, shape index: {}]   ;;  %s1256_s7 = inlined_call_operand.hbm [shape: f32[8,128], index: 7, kind: output, shape index: {}]  }
   0x1   :  { %v915_v0 = vld [vmem:[%s1250_s1 + $0x40] sm:$0xff]   ;;  %v919_v4 = vld [vmem:[%s1250_s1 + $0x48] sm:$0xff]   ;;  %v923_v8 = vld [vmem:[%s1250_s1 + $0x50] sm:$0xff]  }
   0x2   :  { %v916_v1 = vld [vmem:[%s1250_s1] sm:$0xff]   ;;  %816 = vmatprep.subr.bf16.mxu0 %v915_v0  ;;  %v920_v5 = vld [vmem:[%s1250_s1 + $0x8] sm:$0xff]   ;;  %v924_v9 = vld [vmem:[%s1250_s1 + $0x10] sm:$0xff]  }
   0x3   :  { %v917_v2 = vld [vmem:[%s1250_s1 + $0xc0] sm:$0xff]   ;;  %817 = vmatpush3.bf16.msra.mxu0 %v916_v1  ;;  %v921_v6 = vld [vmem:[%s1250_s1 + $0xc8] sm:$0xff]   ;;  %v925_v10 = vld [vmem:[%s1250_s1 + $0xd0] sm:$0xff]  }
   0x4   :  { %v918_v3 = vld [vmem:[%s1250_s1 + $0x80] sm:$0xff]   ;;  %838 = vmatprep.subr.bf16.mxu1 %v917_v2  ;;  %818 = vmatprep.subr.bf16.mxu0 %v919_v4  ;;  %v922_v7 = vld [vmem:[%s1250_s1 + $0x88] sm:$0xff]   ;;  %v926_v11 = vld [vmem:[%s1250_s1 + $0x90] sm:$0xff]  }
   0x5   :  { %839 = vmatpush3.bf16.msra.mxu1 %v918_v3  ;;  %v927_v12 = vld [vmem:[%s1250_s1 + $0x58] sm:$0xff]   ;;  %v931_v16 = vld [vmem:[%s1250_s1 + $0x60] sm:$0xff]   ;;  %v935_v20 = vld [vmem:[%s1250_s1 + $0x68] sm:$0xff]  }
   0x6   :  { %840 = vmatprep.subr.bf16.mxu1 %v921_v6  ;;  %v928_v13 = vld [vmem:[%s1250_s1 + $0x18] sm:$0xff]   ;;  %v932_v17 = vld [vmem:[%s1250_s1 + $0x20] sm:$0xff]   ;;  %v936_v21 = vld [vmem:[%s1250_s1 + $0x28] sm:$0xff]  }
   0x7   :  { %819 = vmatpush3.bf16.msra.mxu0 %v920_v5  ;;  %v929_v14 = vld [vmem:[%s1250_s1 + $0xd8] sm:$0xff]   ;;  %v933_v18 = vld [vmem:[%s1250_s1 + $0xe0] sm:$0xff]   ;;  %v937_v22 = vld [vmem:[%s1250_s1 + $0xe8] sm:$0xff]  }
   0x8   :  { %820 = vmatprep.subr.bf16.mxu0 %v923_v8  ;;  %v930_v15 = vld [vmem:[%s1250_s1 + $0x98] sm:$0xff]   ;;  %v934_v19 = vld [vmem:[%s1250_s1 + $0xa0] sm:$0xff]   ;;  %v938_v23 = vld [vmem:[%s1250_s1 + $0xa8] sm:$0xff]  }
   0x9   :  { %841 = vmatpush3.bf16.msra.mxu1 %v922_v7  ;;  %v939_v24 = vld [vmem:[%s1250_s1 + $0x70] sm:$0xff]   ;;  %v943_v28 = vld [vmem:[%s1250_s1 + $0x78] sm:$0xff]   ;;  %v29_v31 = vld [vmem:[%s1249_s0 + $0x8] sm:$0xff] }
   0xa   :  { %842 = vmatprep.subr.bf16.mxu1 %v925_v10  ;;  %v940_v25 = vld [vmem:[%s1250_s1 + $0x30] sm:$0xff]   ;;  %v944_v29 = vld [vmem:[%s1250_s1 + $0x38] sm:$0xff]   ;;  %v36_v32 = vpack.c.bf16 %v29_v31, %v29_v31  ;;  %v28_v34 = vld [vmem:[%s1249_s0] sm:$0xff] }
   0xb   :  { %821 = vmatpush3.bf16.msra.mxu0 %v924_v9  ;;  %v941_v26 = vld [vmem:[%s1250_s1 + $0xf0] sm:$0xff]   ;;  %v945_v30 = vld [vmem:[%s1250_s1 + $0xf8] sm:$0xff]   ;;  %v35_v35 = vpack.c.bf16 %v28_v34, %v28_v34  ;;  %v947_v36 = vld [vmem:[%s1250_s1 + $0x140] sm:$0xff]  }
   0xc   :  { %822 = vmatprep.subr.bf16.mxu0 %v927_v12  ;;  %v942_v27 = vld [vmem:[%s1250_s1 + $0xb0] sm:$0xff]   ;;  %v946_v33 = vld [vmem:[%s1250_s1 + $0xb8] sm:$0xff]   ;;  %477 = vmatprep.mubr.bf16.mxu0 %v36_v32  ;;  %v948_v39 = vld [vmem:[%s1250_s1 + $0x100] sm:$0xff]  }
   0xd   :  { %843 = vmatpush3.bf16.msra.mxu1 %v926_v11  ;;  %v31_v37 = vld [vmem:[%s1249_s0 + $0x18] sm:$0xff]  ;;  %v30_v40 = vld [vmem:[%s1249_s0 + $0x10] sm:$0xff]  ;;  %v949_v42 = vld [vmem:[%s1250_s1 + $0x148] sm:$0xff]  }
   0xe   :  { %844 = vmatprep.subr.bf16.mxu1 %v929_v14  ;;  %v38_v38 = vpack.c.bf16 %v31_v37, %v31_v37  ;;  %v37_v41 = vpack.c.bf16 %v30_v40, %v30_v40  ;;  %v950_v43 = vld [vmem:[%s1250_s1 + $0x108] sm:$0xff]   ;;  %v951_v45 = vld [vmem:[%s1250_s1 + $0x150] sm:$0xff]   ;;  %v953_v47 = vld [vmem:[%s1250_s1 + $0x158] sm:$0xff]  }
   0xf   :  { %823 = vmatpush3.bf16.msra.mxu0 %v928_v13  ;;  %v952_v46 = vld [vmem:[%s1250_s1 + $0x110] sm:$0xff]   ;;  %v954_v48 = vld [vmem:[%s1250_s1 + $0x118] sm:$0xff]   ;;  %v955_v49 = vld [vmem:[%s1250_s1 + $0x160] sm:$0xff]  }
  0x10   :  { %824 = vmatprep.subr.bf16.mxu0 %v931_v16  ;;  %517 = vmatprep.mubr.bf16.mxu1 %v38_v38  ;;  %v956_v50 = vld [vmem:[%s1250_s1 + $0x120] sm:$0xff]   ;;  %v957_v51 = vld [vmem:[%s1250_s1 + $0x168] sm:$0xff]   ;;  %v959_v55 = vld [vmem:[%s1250_s1 + $0x170] sm:$0xff]  }
  0x11   :  { %845 = vmatpush3.bf16.msra.mxu1 %v930_v15  ;;  %v958_v52 = vld [vmem:[%s1250_s1 + $0x128] sm:$0xff]   ;;  %v963_v53 = vld [vmem:[%s1250_s1 + $0x180] sm:$0xff]   ;;  %v34_v57 = vld [vmem:[%s1249_s0 + $0x30] sm:$0xff] }
  0x12   :  { %846 = vmatprep.subr.bf16.mxu1 %v933_v18  ;;  %v33_v54 = vld [vmem:[%s1249_s0 + $0x28] sm:$0xff]  ;;  %v41_v58 = vpack.c.bf16 %v34_v57, %v34_v57 }
  0x13   :  { %825 = vmatpush3.bf16.msra.mxu0 %v932_v17  ;;  %v40_v56 = vpack.c.bf16 %v33_v54, %v33_v54 }
  0x14   :  { %826 = vmatprep.subr.bf16.mxu0 %v935_v20 }
  0x15   :  { %847 = vmatpush3.bf16.msra.mxu1 %v934_v19 }
  0x16   :  { %848 = vmatprep.subr.bf16.mxu1 %v937_v22 }
  0x17   :  { %827 = vmatpush3.bf16.msra.mxu0 %v936_v21 }
  0x18   :  { %828 = vmatprep.subr.bf16.mxu0 %v939_v24 }
  0x19   :  { %849 = vmatpush3.bf16.msra.mxu1 %v938_v23 }
  0x1a   :  { %850 = vmatprep.subr.bf16.mxu1 %v941_v26 }
  0x1b   :  { %829 = vmatpush3.bf16.msra.mxu0 %v940_v25 }
  0x1c   :  { %830 = vmatprep.subr.bf16.mxu0 %v943_v28 }
  0x1d   :  { %851 = vmatpush3.bf16.msra.mxu1 %v942_v27 }
  0x1e   :  { %852 = vmatprep.subr.bf16.mxu1 %v945_v30 }
  0x1f   :  { %831 = vmatpush3.bf16.msra.mxu0 %v944_v29 }
  0x20   :  { %860 = vmatprep.subr.bf16.mxu0 %v947_v36 }
  0x21   :  { %853 = vmatpush3.bf16.msra.mxu1 %v946_v33 }
  0x22   :  { %478 = vmatmul.mubr.bf16.vlgmr.msra.gmra.mrb[0].mxu0 %v35_v35  ;;  %890 = vmatprep.subr.bf16.mxu1 %v992_v44 }
  0x23   :  { %861 = vmatpush3.bf16.msra.mxu0 %v948_v39  ;;  %557 = vmatprep.mubr.bf16.mxu0 %v40_v56 }
  0x24   :  { %518 = vmatmul.mubr.bf16.vlgmr.msra.gmra.mrb[0].mxu1 %v37_v41  ;;  %862 = vmatprep.subr.bf16.mxu0 %v949_v42 }
  0x25   :  { %892 = vmatprep.mubr.msk.bf16.mxu1 %vm993_vm0, %v992_v44  ;;  %891 = vmatpush3.bf16.msra.mxu1 %v963_v53 }
  0x26   :  { %896 = vmatprep.subr.bf16.mxu1 %v992_v44 }
  0x27   :  { %863 = vmatpush3.bf16.msra.mxu0 %v950_v43 }
  0x28   :  { %864 = vmatprep.subr.bf16.mxu0 %v951_v45 }
  0x2b   :  { %865 = vmatpush3.bf16.msra.mxu0 %v952_v46 }
  0x2c   :  { %866 = vmatprep.subr.bf16.mxu0 %v953_v47 }
  0x2f   :  { %867 = vmatpush3.bf16.msra.mxu0 %v954_v48 }
  0x30   :  { %868 = vmatprep.subr.bf16.mxu0 %v955_v49 }
  0x33   :  { %869 = vmatpush3.bf16.msra.mxu0 %v956_v50 }
  0x34   :  { %870 = vmatprep.subr.bf16.mxu0 %v957_v51 }
  0x35   :  { %12 = vsyncpa [#allocation3], 0  ;;  %893 = vmatmul.mubr.msk.bf16.vlgmr.msra.gmra.mrb[4].mxu1 %vm441_vm1, %v41_v58  ;;  %v960_v59 = vld [vmem:[%s1250_s1 + $0x130] sm:$0xff]   ;;  %v961_v60 = vld [vmem:[%s1250_s1 + $0x178] sm:$0xff]   ;;  %vm630_vm2 = vcmask 261120   ;;  %s994_s8 = smov [#allocation2]  }
  0x36   :  { %900 = vmatprep.mubr.msk.bf16.mxu1 %vm993_vm0, %v992_v44  ;;  %v962_v61 = vld [vmem:[%s1250_s1 + $0x138] sm:$0xff]   ;;  %v32_v62 = vld [vmem:[%s1249_s0 + $0x20] sm:$0xff]  ;;  %v965_v1 = vld [vmem:[%s1252_s3 + $0x8] sm:$0xff]  }
  0x37   :  { %871 = vmatpush3.bf16.msra.mxu0 %v958_v52  ;;  %v39_v63 = vpack.c.bf16 %v32_v62, %v32_v62  ;;  %v964_v0 = vld [vmem:[%s1252_s3] sm:$0xff]   ;;  %v967_v29 = vld [vmem:[%s1254_s5 + $0x8] sm:$0xff]  }
  0x38   :  { %872 = vmatprep.subr.bf16.mxu0 %v959_v55  ;;  %897 = vmatpush3.bf16.msra.mxu1 %v964_v0  ;;  %v757_v3 = vld [vmem:[%s1251_s2] ss:$0 sm:$0xff] }
  0x39   :  { %898 = vmatprep.subr.bf16.mxu1 %v992_v44  ;;  %v966_v27 = vld [vmem:[%s1254_s5] sm:$0xff]   ;;  %s749_s5 = sshll.u32 %s994_s8, 4  ;;  %s750_s5 = int_to_ptr.vmem [resolvable:$true] %s749_s5 }
  0x3a   :  { %v808_v30 = vld [vmem:[%s1253_s4] ss:$0 sm:$0xff]  ;;  %s968_s4 = scalar_lea.vmem %s750_s5, 128  ;;  %p973_p1 = scmp.lt.s32.totalorder %s750_s5, %s750_s5 }
  0x3b   :  { %873 = vmatpush3.bf16.msra.mxu0 %v960_v59  ;;  %v812_v38 = vld [vmem:[%s1255_s6] ss:$0 sm:$0xff]  ;;  %p969_p0 = scmp.ne.s32.totalorder %s750_s5, %s968_s4  ;;  %p974_p2 = scmp.lt.s32.totalorder %s968_s4, %s968_s4 }
  0x3c   :  { %874 = vmatprep.subr.bf16.mxu0 %v961_v60  ;;  %899 = vmatpush3.bf16.msra.mxu1 %v965_v1 }
  0x3d   :  { %904 = vmatprep.subr.bf16.mxu1 %v992_v44  ;;  %p975_p3 = por %p974_p2, %p973_p1 }
  0x3f   :  { %875 = vmatpush3.bf16.msra.mxu0 %v962_v61  ;;  %p976_p4 = pnand %p975_p3, %p969_p0 }
  0x42   :  { %558 = vmatmul.mubr.bf16.vlgmr.msra.gmra.mrb[4].mxu0 %v39_v63 }
  0xf5   :  { %v832_v2 = vpop.f32.mrb[0].mxu0 }
  0xf6   :  { %v833_v4 = vpop.f32.mrb[1].mxu0 }
  0xf7   :  { %v834_v5 = vadd.f32 %v833_v4, %v832_v2  ;;  %v835_v6 = vpop.f32.mrb[2].mxu0  ;;  %v854_v7 = vpop.f32.mrb[0].mxu1 }
  0xf8   :  { %v836_v8 = vpop.f32.mrb[3].mxu0  ;;  %v855_v10 = vpop.f32.mrb[1].mxu1 }
  0xf9   :  { %v480_v9 = vadd.f32 %v834_v5, %v757_v3  ;;  %v856_v11 = vadd.f32 %v855_v10, %v854_v7  ;;  %v857_v12 = vpop.f32.mrb[2].mxu1 }
  0xfa   :  { %v858_v13 = vpop.f32.mrb[3].mxu1 }
  0xfb   :  { %v520_v14 = vadd.f32 %v856_v11, %v480_v9 }
 0x108   :  { %v599_v15 = vpop.f32.mrb[4].mxu1 }
 0x109   :  { %v894_v16 = vpop.f32.mrb[5].mxu1 }
 0x10a   :  { %v602_v17 = vpop.f32.mrb[6].mxu1 }
 0x10b   :  { %v895_v18 = vpop.f32.mrb[7].mxu1 }
 0x115   :  { %v876_v19 = vpop.f32.mrb[4].mxu0 }
 0x116   :  { %v877_v20 = vpop.f32.mrb[5].mxu0 }
 0x117   :  { %v878_v21 = vadd.f32 %v877_v20, %v876_v19  ;;  %v879_v22 = vpop.f32.mrb[6].mxu0 }
 0x118   :  { %v880_v23 = vpop.f32.mrb[7].mxu0 }
 0x119   :  { %v560_v24 = vadd.f32 %v878_v21, %v520_v14 }
 0x11b   :  { %v600_v25 = vadd.f32 %v599_v15, %v560_v24 }
 0x11d   :  { %v605_v26 = vmax.f32 %v600_v25, 0.0 }
 0x11f   :  { %v606_v28 = vpack.c.bf16 %v605_v26, %v605_v26 }
 0x121   :  { %901 = vmatmul.mubr.msk.bf16.vlgmr.msra.gmra.mrb[8].mxu1 %vm630_vm2, %v606_v28 }
 0x122   :  { %905 = vmatpush3.bf16.msra.mxu1 %v966_v27  ;;  %908 = vmatprep.mubr.msk.bf16.mxu1 %vm993_vm0, %v992_v44 }
 0x123   :  { %906 = vmatprep.subr.bf16.mxu1 %v992_v44 }
 0x126   :  { %907 = vmatpush3.bf16.msra.mxu1 %v967_v29 }
 0x1f4   :  { %v668_v31 = vpop.f32.mrb[8].mxu1 }
 0x1f5   :  { %v669_v32 = vadd.f32 %v808_v30, %v668_v31  ;;  %v902_v33 = vpop.f32.mrb[9].mxu1 }
 0x1f6   :  { %v671_v34 = vpop.f32.mrb[10].mxu1 }
 0x1f7   :  { %v674_v35 = vmax.f32 %v669_v32, 0.0  ;;  %v903_v36 = vpop.f32.mrb[11].mxu1 }
 0x1f9   :  { %v675_v37 = vpack.c.bf16 %v674_v35, %v674_v35 }
 0x1fb   :  { %909 = vmatmul.mubr.msk.bf16.vlgmr.msra.gmra.mrb[12].mxu1 %vm630_vm2, %v675_v37 }
 0x2ce   :  { %v736_v39 = vpop.f32.mrb[12].mxu1 }
 0x2cf   :  { %v737_v40 = vadd.f32 %v812_v38, %v736_v39  ;;  %v910_v41 = vpop.f32.mrb[13].mxu1 }
 0x2d0   :  { %v739_v42 = vpop.f32.mrb[14].mxu1 }
 0x2d1   :  { %742 = vst [vmem:[#allocation2] sm:$0xff] %v737_v40  ;;  %v911_v43 = vpop.f32.mrb[15].mxu1 }
 0x2d2   :  { %979 = shalt.err (!%p976_p4)
}
 0x2d3   :  { %s980_s6 = scalar_lea.hbm %s1256_s7, 128 }
 0x2d4   :  { %p981_p5 = scmp.ne.s32.totalorder %s1256_s7, %s980_s6  ;;  %p984_p6 = scmp.lt.u32.totalorder %s980_s6, %s1256_s7 }
 0x2d6   :  { %p986_p7 = pnand %p984_p6, %p981_p5 }
 0x2d8   :  { %989 = shalt.err (!%p986_p7)
}
 0x2d9   :  { %752 = dma.vmem_to_hbm [thread:$0]  %s750_s5, 128, %s1256_s7, [#allocation3]  }
 0x2da   :  { %990 = dma.done.wait [#allocation3], 128  }
 0x2db   :  { %991 = vsyncadd [#allocation3], 4294967168 }
 0x2dc   :  { %756 = vsyncpa [#allocation3], 1 }

</bundles_post_ra>
